<compile_context>
chip_gen: v5e
topology: v5e:2x2
jax: 0.10.0
libtpu: 0.0.40
codegen_flags: <defaults>
</compile_context>

<pallas_src>
import jax
import jax.numpy as jnp
from jax.experimental import pallas as pl
from jax.experimental.pallas import tpu as pltpu


def _round_up(a, b):
    return (a + b - 1) // b * b


def _device_kind():
    try:
        return jax.devices()[0].device_kind.lower()
    except Exception:
        return ""


def _mxu_edge():
    # v5e MXU tiles are 128x128; v6e / v7x are 256x256.
    return 128 if "v5" in _device_kind() else 256


def _vmem_limit_bytes(frac=0.80):
    cap = None
    try:
        cap = int(pltpu.get_tpu_info().vmem_capacity_bytes)
    except Exception:
        cap = None
    if not cap:
        kind = _device_kind()
        # v5e/v6e: 128 MiB physical VMEM; v7x: 64 MiB per TensorCore.
        cap = 128 * 1024 * 1024 if ("v5" in kind or "v6" in kind) else 64 * 1024 * 1024
    return int(cap * frac)


def _bspec(shape, index_map, n_buffers=None):
    """BlockSpec with an optional buffer-count override (graceful fallback)."""
    if n_buffers is not None:
        try:
            return pl.BlockSpec(shape, index_map,
                                pipeline_mode=pl.Buffered(n_buffers))
        except (TypeError, AttributeError):
            pass
    return pl.BlockSpec(shape, index_map)


# ----------------------------------------------------------------------------
# One-time weight packing (hoisted out of the forward path).
# ----------------------------------------------------------------------------
class PackedDecompAE:
    """Pre-padded / pre-transposed weights for decomp_ae_forward_packed."""

    def __init__(self, wl_t, we_t, wd_t, b_l, b_d, d_in, d_out, tn):
        self.wl_t, self.we_t, self.wd_t = wl_t, we_t, wd_t
        self.b_l, self.b_d = b_l, b_d
        self.d_in, self.d_out = d_in, d_out
        self.d_in_p = wl_t.shape[0]
        self.d_out_g = wl_t.shape[1]
        self.r_p = wd_t.shape[0]
        self.tn = tn
        self.compute_dtype = wl_t.dtype


def pack_decomp_ae_weights(w_layer, b_layer, w_enc, w_dec, b_dec, *,
                           compute_dtype=jnp.bfloat16, tn=512):
    """Pack once; weights use the PyTorch [out_features, in_features] layout."""
    d_out, d_in = w_layer.shape
    r = w_enc.shape[0]
    cdt = jnp.dtype(compute_dtype)

    d_in_p = _round_up(d_in, 128)
    d_out_p = _round_up(d_out, 128)
    r_p = _round_up(max(r, 1), 128)

    # N (output-feature) tile: whole width if it fits the request, otherwise a
    # 128-multiple divisor of d_out_p (or pad D_out up to a multiple of tn).
    tn_req = max(128, _round_up(tn, 128))
    if d_out_p <= tn_req:
        tn_eff = d_out_p
    else:
        nblk = d_out_p // 128
        best = 1
        for d in range(1, nblk + 1):
            if nblk % d == 0 and d * 128 <= tn_req:
                best = d
        tn_eff = best * 128
        if tn_eff < 256 <= tn_req:
            tn_eff = tn_req                     # prefer a big tile; pad D_out
    d_out_g = _round_up(d_out_p, tn_eff)

    def pad2(a, rows, cols):
        return jnp.pad(a, ((0, rows - a.shape[0]), (0, cols - a.shape[1])))

    wl_t = pad2(w_layer, d_out_g, d_in_p).T.astype(cdt)          # (d_in_p, d_out_g)
    we_t = pad2(w_enc, r_p, d_in_p).T.astype(cdt)                # (d_in_p, r_p)
    wd_t = pad2(w_dec, d_out_g, r_p).T.astype(cdt)               # (r_p, d_out_g)
    b_l = jnp.pad(b_layer, (0, d_out_g - d_out)).reshape(1, d_out_g).astype(jnp.float32)
    b_d = jnp.pad(b_dec, (0, d_out_g - d_out)).reshape(1, d_out_g).astype(jnp.float32)
    return PackedDecompAE(wl_t, we_t, wd_t, b_l, b_d, d_in, d_out, tn_eff)


# ----------------------------------------------------------------------------
# Kernel body.
# ----------------------------------------------------------------------------
def _decomp_ae_kernel(x_ref, wl_ref, we_ref, wd_ref, bl_ref, bd_ref,
                      out_ref, out_ae_ref, z_ref):
    j = pl.program_id(1)
    x = x_ref[...]                                            # (tm, d_in_p)

    # Tiny-rank encoder matmul: once per row tile, reused by every N tile.
    @pl.when(j == 0)
    def _():
        z_ref[...] = jnp.dot(x, we_ref[...], preferred_element_type=jnp.float32)

    # layer(x) for this N tile.
    y = jnp.dot(x, wl_ref[...], preferred_element_type=jnp.float32) + bl_ref[...]
    out_ref[...] = y.astype(out_ref.dtype)

    # autoencoder(x): decode z for this N tile.
    z = z_ref[...].astype(wd_ref.dtype)
    y_ae = jnp.dot(z, wd_ref[...], preferred_element_type=jnp.float32) + bd_ref[...]
    out_ae_ref[...] = y_ae.astype(out_ae_ref.dtype)


# ----------------------------------------------------------------------------
# Forward wrappers.
# ----------------------------------------------------------------------------
def decomp_ae_forward_packed(x, packed, *, tm=512, out_dtype=None):
    """Returns (out_ae, out): out_ae is what PyTorch forward() returns,
    out mirrors self.out."""
    m, d_in = x.shape
    assert d_in == packed.d_in, "x feature dim does not match packed weights"
    d_in_p, d_out_g = packed.d_in_p, packed.d_out_g
    r_p, tn, d_out = packed.r_p, packed.tn, packed.d_out
    cdt = jnp.dtype(packed.compute_dtype)
    out_dt = jnp.dtype(out_dtype) if out_dtype is not None else x.dtype

    # Row tile: MXU-edge multiples when M is large; >=2 grid steps when small
    # (so the "parallel" M axis can shard across both v7x TensorCores).
    edge = _mxu_edge()
    if m >= 2 * edge:
        cap = max(edge, (m // 2) // edge * edge)
        tm_eff = min(_round_up(max(tm, edge), edge), cap)
    else:
        cap = _round_up((m + 1) // 2, 8) if m > 8 else 8
        tm_eff = max(8, min(_round_up(tm, 8), cap))
    m_p = _round_up(m, tm_eff)

    xp = jnp.pad(x, ((0, m_p - m), (0, d_in_p - d_in))).astype(cdt)

    n_m = m_p // tm_eff
    n_n = d_out_g // tn
    weights_const = (n_n == 1)     # blocks never change -> single-buffer them

    flops = (2 * m_p * d_in_p * d_out_g        # layer
             + 2 * m_p * d_in_p * r_p          # encoder (once per row tile)
             + 2 * m_p * r_p * d_out_g)        # decoder
    bytes_accessed = (
        xp.size * cdt.itemsize
        + (packed.wl_t.size + packed.we_t.size + packed.wd_t.size) * cdt.itemsize
        + (packed.b_l.size + packed.b_d.size) * 4
        + 2 * m_p * d_out_g * out_dt.itemsize)
    cost = pl.CostEstimate(flops=int(flops), transcendentals=0,
                           bytes_accessed=int(bytes_accessed))

    out_shapes = (
        jax.ShapeDtypeStruct((m_p, d_out_g), out_dt),   # out    (= self.out)
        jax.ShapeDtypeStruct((m_p, d_out_g), out_dt),   # out_ae (returned)
    )

    out_p, out_ae_p = pl.pallas_call(
        _decomp_ae_kernel,
        out_shape=out_shapes,
        grid_spec=pltpu.PrefetchScalarGridSpec(
            num_scalar_prefetch=0,
            grid=(n_m, n_n),
            in_specs=[
                _bspec((tm_eff, d_in_p), lambda i, j: (i, 0)),            # x rows
                _bspec((d_in_p, tn), lambda i, j: (0, j),
                       n_buffers=1 if weights_const else None),           # W_l^T
                _bspec((d_in_p, r_p), lambda i, j: (0, 0), n_buffers=1),  # W_e^T
                _bspec((r_p, tn), lambda i, j: (0, j),
                       n_buffers=1 if weights_const else None),           # W_d^T
                _bspec((1, tn), lambda i, j: (0, j),
                       n_buffers=1 if weights_const else None),           # b_l
                _bspec((1, tn), lambda i, j: (0, j),
                       n_buffers=1 if weights_const else None),           # b_d
            ],
            out_specs=[
                pl.BlockSpec((tm_eff, tn), lambda i, j: (i, j)),
                pl.BlockSpec((tm_eff, tn), lambda i, j: (i, j)),
            ],
            scratch_shapes=[pltpu.VMEM((tm_eff, r_p), jnp.float32)],      # z = x@We^T
        ),
        compiler_params=pltpu.CompilerParams(
            dimension_semantics=("parallel", "arbitrary"),
            vmem_limit_bytes=_vmem_limit_bytes()),
        cost_estimate=cost,
    )(xp, packed.wl_t, packed.we_t, packed.wd_t, packed.b_l, packed.b_d)

    # Strip padding.
    return out_ae_p[:m, :d_out], out_p[:m, :d_out]


def decomp_ae_forward(x, w_layer, b_layer, w_enc, w_dec, b_dec, *,
                      tm=512, tn=512, compute_dtype=jnp.bfloat16, out_dtype=None):
    """Convenience one-shot wrapper (pack + forward)."""
    packed = pack_decomp_ae_weights(w_layer, b_layer, w_enc, w_dec, b_dec,
                                    compute_dtype=compute_dtype, tn=tn)
    return decomp_ae_forward_packed(x, packed, tm=tm, out_dtype=out_dtype)


def _uniform(key, shape, fan_in):
    # Matches nn.Linear's default U(-1/sqrt(fan_in), +1/sqrt(fan_in)).
    bound = 1.0 / jnp.sqrt(jnp.asarray(fan_in, jnp.float32))
    return jax.random.uniform(key, shape, jnp.float32, -bound, bound)


if __name__ == "__main__":
    key = jax.random.PRNGKey(0)

    # --- Case 1: small shapes, single N tile, multi-step M grid -------------
    M, D_IN, D_OUT, R = 200, 96, 112, 24
    k = jax.random.split(key, 6)
    x = jax.random.normal(k[0], (M, D_IN), jnp.float32)
    w_layer = _uniform(k[1], (D_OUT, D_IN), D_IN)   # layer.weight
    b_layer = _uniform(k[2], (D_OUT,), D_IN)        # layer.bias
    w_enc = _uniform(k[3], (R, D_IN), D_IN)         # encoder weight
    w_dec = _uniform(k[4], (D_OUT, R), R)           # decoder weight
    b_dec = _uniform(k[5], (D_OUT,), R)             # decoder bias

    ref_out = x @ w_layer.T + b_layer
    ref_out_ae = (x @ w_enc.T) @ w_dec.T + b_dec

    # Hoisted packing (done once), f32 compute path (strict check).
    packed_f32 = pack_decomp_ae_weights(w_layer, b_layer, w_enc, w_dec, b_dec,
                                        compute_dtype=jnp.float32)
    out_ae, out = decomp_ae_forward_packed(x, packed_f32, tm=64)
    jax.block_until_ready((out_ae, out))
    assert out.shape == (M, D_OUT) and out_ae.shape == (M, D_OUT)
    assert jnp.allclose(out, ref_out, atol=1e-4, rtol=1e-4)
    assert jnp.allclose(out_ae, ref_out_ae, atol=1e-4, rtol=1e-4)

    # Default bf16 MXU path, reusing another one-time pack (loose check).
    packed_bf16 = pack_decomp_ae_weights(w_layer, b_layer, w_enc, w_dec, b_dec)
    out_ae_b, out_b = decomp_ae_forward_packed(x, packed_bf16, tm=64)
    jax.block_until_ready((out_ae_b, out_b))
    assert jnp.allclose(out_b, ref_out, atol=5e-2, rtol=5e-2)
    assert jnp.allclose(out_ae_b, ref_out_ae, atol=5e-2, rtol=5e-2)

    # --- Case 2: exercises a multi-step N (D_out) grid axis -----------------
    M2, D_IN2, D_OUT2, R2 = 192, 160, 300, 16
    k2 = jax.random.split(jax.random.PRNGKey(1), 6)
    x2 = jax.random.normal(k2[0], (M2, D_IN2), jnp.float32)
    w_layer2 = _uniform(k2[1], (D_OUT2, D_IN2), D_IN2)
    b_layer2 = _uniform(k2[2], (D_OUT2,), D_IN2)
    w_enc2 = _uniform(k2[3], (R2, D_IN2), D_IN2)
    w_dec2 = _uniform(k2[4], (D_OUT2, R2), R2)
    b_dec2 = _uniform(k2[5], (D_OUT2,), R2)

    ref_out2 = x2 @ w_layer2.T + b_layer2
    ref_out_ae2 = (x2 @ w_enc2.T) @ w_dec2.T + b_dec2

    out_ae2, out2 = decomp_ae_forward(x2, w_layer2, b_layer2, w_enc2, w_dec2,
                                      b_dec2, tm=128, tn=128,
                                      compute_dtype=jnp.float32)
    jax.block_until_ready((out_ae2, out2))
    assert out2.shape == (M2, D_OUT2) and out_ae2.shape == (M2, D_OUT2)
    assert jnp.allclose(out2, ref_out2, atol=1e-4, rtol=1e-4)
    assert jnp.allclose(out_ae2, ref_out_ae2, atol=1e-4, rtol=1e-4)

    print("KERNEL_OK")
</pallas_src>

<mosaic_0001>
module attributes {stable_mosaic.version = 11 : i64} {
  func.func @_decomp_ae_kernel(%arg0: i32, %arg1: i32, %arg2: memref<64x128xf32, #tpu.memory_space<vmem>>, %arg3: memref<128x128xf32, #tpu.memory_space<vmem>>, %arg4: memref<128x128xf32, #tpu.memory_space<vmem>>, %arg5: memref<128x128xf32, #tpu.memory_space<vmem>>, %arg6: memref<1x128xf32, #tpu.memory_space<vmem>>, %arg7: memref<1x128xf32, #tpu.memory_space<vmem>>, %arg8: memref<64x128xf32, #tpu.memory_space<vmem>>, %arg9: memref<64x128xf32, #tpu.memory_space<vmem>>, %arg10: memref<64x128xf32, #tpu.memory_space<vmem>>) attributes {dimension_semantics = [#tpu.dimension_semantics<parallel>, #tpu.dimension_semantics<arbitrary>], iteration_bounds = array<i64: 4, 1>, scalar_prefetch = 0 : i64, scratch_operands = 1 : i64, tpu.core_type = #tpu.core_type<tc>, window_params = [{transform_indices = @transform_0, window_bounds = array<i64: 64, 128>}, {pipeline_mode = #tpu.pipeline_mode<synchronous>, transform_indices = @transform_1, window_bounds = array<i64: 128, 128>}, {pipeline_mode = #tpu.pipeline_mode<synchronous>, transform_indices = @transform_2, window_bounds = array<i64: 128, 128>}, {pipeline_mode = #tpu.pipeline_mode<synchronous>, transform_indices = @transform_3, window_bounds = array<i64: 128, 128>}, {pipeline_mode = #tpu.pipeline_mode<synchronous>, transform_indices = @transform_4, window_bounds = array<i64: 1, 128>}, {pipeline_mode = #tpu.pipeline_mode<synchronous>, transform_indices = @transform_5, window_bounds = array<i64: 1, 128>}, {transform_indices = @transform_6, window_bounds = array<i64: 64, 128>}, {transform_indices = @transform_7, window_bounds = array<i64: 64, 128>}]} {
    %c0 = arith.constant 0 : index
    %c0_0 = arith.constant 0 : index
    %0 = vector.load %arg2[%c0, %c0_0] : memref<64x128xf32, #tpu.memory_space<vmem>>, vector<64x128xf32>
    %c0_i32 = arith.constant 0 : i32
    %1 = arith.cmpi eq, %arg1, %c0_i32 : i32
    %2 = arith.extui %1 : i1 to i32
    %c0_i32_1 = arith.constant 0 : i32
    %3 = arith.cmpi ne, %2, %c0_i32_1 : i32
    scf.if %3 {
      %c0_17 = arith.constant 0 : index
      %c0_18 = arith.constant 0 : index
      %17 = vector.load %arg4[%c0_17, %c0_18] : memref<128x128xf32, #tpu.memory_space<vmem>>, vector<128x128xf32>
      %cst_19 = arith.constant dense<0.000000e+00> : vector<64x128xf32>
      %18 = tpu.matmul %0, %17, %cst_19 {dimension_numbers = #tpu.dot_dimension_numbers<[1], [0], [0], [1], [0, 0, 1, 1], [], []>} : vector<64x128xf32>, vector<128x128xf32>, vector<64x128xf32> -> vector<64x128xf32>
      %c0_20 = arith.constant 0 : index
      %c0_21 = arith.constant 0 : index
      %19 = vector.load %arg10[%c0_20, %c0_21] : memref<64x128xf32, #tpu.memory_space<vmem>>, vector<64x128xf32>
      tpu.vector_store %arg10[%c0_20, %c0_21], %18 {strides = array<i32>} : memref<64x128xf32, #tpu.memory_space<vmem>>, vector<64x128xf32>,
    } else {
    }
    %c0_2 = arith.constant 0 : index
    %c0_3 = arith.constant 0 : index
    %4 = vector.load %arg3[%c0_2, %c0_3] : memref<128x128xf32, #tpu.memory_space<vmem>>, vector<128x128xf32>
    %cst = arith.constant dense<0.000000e+00> : vector<64x128xf32>
    %5 = tpu.matmul %0, %4, %cst {dimension_numbers = #tpu.dot_dimension_numbers<[1], [0], [0], [1], [0, 0, 1, 1], [], []>} : vector<64x128xf32>, vector<128x128xf32>, vector<64x128xf32> -> vector<64x128xf32>
    %c0_4 = arith.constant 0 : index
    %c0_5 = arith.constant 0 : index
    %6 = vector.load %arg6[%c0_4, %c0_5] : memref<1x128xf32, #tpu.memory_space<vmem>>, vector<1x128xf32>
    %7 = vector.broadcast %6 : vector<1x128xf32> to vector<64x128xf32>
    %8 = arith.addf %5, %7 : vector<64x128xf32>
    %c0_6 = arith.constant 0 : index
    %c0_7 = arith.constant 0 : index
    %9 = vector.load %arg8[%c0_6, %c0_7] : memref<64x128xf32, #tpu.memory_space<vmem>>, vector<64x128xf32>
    tpu.vector_store %arg8[%c0_6, %c0_7], %8 {strides = array<i32>} : memref<64x128xf32, #tpu.memory_space<vmem>>, vector<64x128xf32>,
    %c0_8 = arith.constant 0 : index
    %c0_9 = arith.constant 0 : index
    %10 = vector.load %arg10[%c0_8, %c0_9] : memref<64x128xf32, #tpu.memory_space<vmem>>, vector<64x128xf32>
    %c0_10 = arith.constant 0 : index
    %c0_11 = arith.constant 0 : index
    %11 = vector.load %arg5[%c0_10, %c0_11] : memref<128x128xf32, #tpu.memory_space<vmem>>, vector<128x128xf32>
    %cst_12 = arith.constant dense<0.000000e+00> : vector<64x128xf32>
    %12 = tpu.matmul %10, %11, %cst_12 {dimension_numbers = #tpu.dot_dimension_numbers<[1], [0], [0], [1], [0, 0, 1, 1], [], []>} : vector<64x128xf32>, vector<128x128xf32>, vector<64x128xf32> -> vector<64x128xf32>
    %c0_13 = arith.constant 0 : index
    %c0_14 = arith.constant 0 : index
    %13 = vector.load %arg7[%c0_13, %c0_14] : memref<1x128xf32, #tpu.memory_space<vmem>>, vector<1x128xf32>
    %14 = vector.broadcast %13 : vector<1x128xf32> to vector<64x128xf32>
    %15 = arith.addf %12, %14 : vector<64x128xf32>
    %c0_15 = arith.constant 0 : index
    %c0_16 = arith.constant 0 : index
    %16 = vector.load %arg9[%c0_15, %c0_16] : memref<64x128xf32, #tpu.memory_space<vmem>>, vector<64x128xf32>
    tpu.vector_store %arg9[%c0_15, %c0_16], %15 {strides = array<i32>} : memref<64x128xf32, #tpu.memory_space<vmem>>, vector<64x128xf32>,
    return
  }
  func.func @transform_0(%arg0: i32, %arg1: i32) -> (i32, i32) {
    %c0_i32 = arith.constant 0 : i32
    %c0_i32_0 = arith.constant 0 : i32
    return %arg0, %c0_i32 : i32, i32
  }
  func.func @transform_1(%arg0: i32, %arg1: i32) -> (i32, i32) {
    %c0_i32 = arith.constant 0 : i32
    %c0_i32_0 = arith.constant 0 : i32
    return %c0_i32, %arg1 : i32, i32
  }
  func.func @transform_2(%arg0: i32, %arg1: i32) -> (i32, i32) {
    %c0_i32 = arith.constant 0 : i32
    %c0_i32_0 = arith.constant 0 : i32
    %c0_i32_1 = arith.constant 0 : i32
    return %c0_i32, %c0_i32_0 : i32, i32
  }
  func.func @transform_3(%arg0: i32, %arg1: i32) -> (i32, i32) {
    %c0_i32 = arith.constant 0 : i32
    %c0_i32_0 = arith.constant 0 : i32
    return %c0_i32, %arg1 : i32, i32
  }
  func.func @transform_4(%arg0: i32, %arg1: i32) -> (i32, i32) {
    %c0_i32 = arith.constant 0 : i32
    %c0_i32_0 = arith.constant 0 : i32
    return %c0_i32, %arg1 : i32, i32
  }
  func.func @transform_5(%arg0: i32, %arg1: i32) -> (i32, i32) {
    %c0_i32 = arith.constant 0 : i32
    %c0_i32_0 = arith.constant 0 : i32
    return %c0_i32, %arg1 : i32, i32
  }
  func.func @transform_6(%arg0: i32, %arg1: i32) -> (i32, i32) {
    %c0_i32 = arith.constant 0 : i32
    return %arg0, %arg1 : i32, i32
  }
  func.func @transform_7(%arg0: i32, %arg1: i32) -> (i32, i32) {
    %c0_i32 = arith.constant 0 : i32
    return %arg0, %arg1 : i32, i32
  }
}

</mosaic_0001>

<bundles_post_ra>
// kernel: tpu_custom_call.1
= control target key start
LH: loop header
LB: loop body
LE: loop exit
PB: predicated region body
PF: predicated region fallthrough
CT: control target
= control target key end

     0   :  { %s1592_s0 = inlined_call_operand.hbm [shape: f32[256,128], index: 0, kind: input, shape index: {}]   ;;  %s1593_s1 = inlined_call_operand.hbm [shape: f32[128,128], index: 1, kind: input, shape index: {}]   ;;  %s1594_s2 = inlined_call_operand.hbm [shape: f32[128,128], index: 2, kind: input, shape index: {}]   ;;  %s1595_s3 = inlined_call_operand.hbm [shape: f32[128,128], index: 3, kind: input, shape index: {}]   ;;  %s1596_s4 = inlined_call_operand.vmem [shape: f32[1,128], index: 4, kind: input, shape index: {}]   ;;  %s1597_s5 = inlined_call_operand.vmem [shape: f32[1,128], index: 5, kind: input, shape index: {}]   ;;  %s1598_s6 = inlined_call_operand.hbm [shape: f32[256,128], index: 6, kind: output, shape index: {0}]   ;;  %s1599_s7 = inlined_call_operand.hbm [shape: f32[256,128], index: 7, kind: output, shape index: {1}]  }
   0x1   :  { %1604 = sst [smem:[#allocation21_spill]] %s1593_s1 }
   0x2   :  { %1605 = sst [smem:[#allocation22_spill]] %s1594_s2 }
   0x3   :  { %1606 = sst [smem:[#allocation23_spill]] %s1595_s3 }
   0x4   :  { %13 = vsyncpa [#allocation4], 0 }
   0x5   :  { %15 = vsyncpa [#allocation4 + $0x1], 0 }
   0x6   :  { %16 = vsyncpa [#allocation7], 0 }
   0x7   :  { %17 = vsyncpa [#allocation10], 0 }
   0x8   :  { %18 = vsyncpa [#allocation5], 0 }
   0x9   :  { %20 = vsyncpa [#allocation5 + $0x1], 0 }
   0xa   :  { %21 = vsyncpa [#allocation13], 0 }
   0xb   :  { %23 = vsyncpa [#allocation13 + $0x1], 0  ;;  %s1316_s24 = smov 0   ;;  %s1318_s25 = smov 0  }
   0xc   :  { %s1320_s26 = smov 0   ;;  %s1322_s27 = smov 0  }
   0xd   :  { %s1324_s28 = smov 0   ;;  %s1326_s29 = smov 0  }
   0xe LB: > { %s859_s30 = sadd.s32 4294967295, %s1267_s29   ;;  %s860_s8 = sadd.s32 4294967294, %s1267_s29   ;;  %s1267_s29 = sphi %s1326_s29, %s29_s29   ;;  %s1263_s28 = sphi %s1324_s28, %s1628_s28   ;;  %s1259_s27 = sphi %s1322_s27, %s1627_s27   ;;  %s1255_s26 = sphi %s1320_s26, %s1626_s26   ;;  %s1251_s25 = sphi %s1318_s25, %s1625_s25   ;;  %s1247_s24 = sphi %s1316_s24, %s1624_s24  }
   0xf   : > { %p61_p0 = scmp.ne.s32.totalorder %s1251_s25, %s1247_s24  ;;  %p1350_p1 = scmp.eq.s32.totalorder %s859_s30, 0 }
  0x10   : > { %p1354_p2 = scmp.eq.s32.totalorder %s859_s30, 3  ;;  %p218_p3 = scmp.eq.s32.totalorder %s860_s8, 3 }
  0x11   : > { %p1360_p4 = por %p1350_p1, %p61_p0  ;;  %p861_p5 = scmp.ge.s32.totalorder %s1267_s29, 1 }
  0x12   : > { %p1365_p6 = por %p218_p3, %p61_p0  ;;  %p253_p7 = scmp.lt.s32.totalorder %s1267_s29, 5 }
  0x13   : > { %s1612_s1 = sld [smem:[#allocation21_spill]]  ;;  %s1269_s17 = smov [#allocation6]  }
  0x14   : > { %s1610_s12 = scalar_select %p1365_p6, 1, 0 }
  0x15   : > { %p1373_p8 = pnand %p861_p5, %p253_p7  ;;  %s268_s18 = sshll.u32 %s1269_s17, 4  ;;  %s269_s18 = int_to_ptr.vmem [resolvable:$true] %s268_s18 }
  0x16   : > { %1611 = sst [smem:[#allocation19_spill]] %s1610_s12  ;;  %s1600_s23 = smov 128  }
  0x17   : > { %p939_p9 = pneg %p1373_p8  ;;  %s1615_s2 = sld [smem:[#allocation22_spill]] }
  0x18   : > { %s1601_s30 = smov 8   ;;  %s1272_s8 = smov [#allocation8]  }
  0x19   : > { %s266_s15 = sshll.u32 %s1612_s1, 4  ;;  %p1381_p10 = pnand %p939_p9, %p1350_p1  ;;  %s267_s15 = int_to_ptr.hbm [resolvable:$true] %s266_s15 }
  0x1a   : > { %s282_s13 = sshll.u32 %s1272_s8, 4  ;;  %s1616_s3 = sld [smem:[#allocation23_spill]]  ;;  %s283_s13 = int_to_ptr.vmem [resolvable:$true] %s282_s13 }
  0x1b   : > { %942 = dma.hbm_to_vmem [thread:$0]  (!%p1381_p10), %s267_s15, 2048, %s269_s18, [#allocation7], %s1600_s23, %s1600_s23, %s1601_s30  }
  0x1c   : > { %s1273_s21 = smov [#allocation9]   ;;  %s41_s15 = sadd.s32 1, %s1263_s28 }
  0x1d   : > { %s280_s22 = sshll.u32 %s1615_s2, 4  ;;  %s298_s1 = sshll.u32 %s1273_s21, 4  ;;  %s281_s22 = int_to_ptr.hbm [resolvable:$true] %s280_s22  ;;  %s299_s1 = int_to_ptr.vmem [resolvable:$true] %s298_s1 }
  0x1e   : > { %945 = dma.hbm_to_vmem [thread:$0]  (!%p1381_p10), %s281_s22, 2048, %s283_s13, [#allocation7], %s1600_s23, %s1600_s23, %s1601_s30  }
  0x1f   : > { %p43_p11 = scmp.ge.s32.totalorder %s41_s15, 4  ;;  %s48_s18 = sadd.s32 1, %s1255_s26 }
  0x20   : > { %s296_s20 = sshll.u32 %s1616_s3, 4  ;;  %p55_p12 = scmp.ne.s32.totalorder %s1255_s26, %s1251_s25  ;;  %s297_s20 = int_to_ptr.hbm [resolvable:$true] %s296_s20 }
  0x21   : > { %948 = dma.hbm_to_vmem [thread:$0]  (!%p1381_p10), %s297_s20, 2048, %s299_s1, [#allocation10], %s1600_s23, %s1600_s23, %s1601_s30  }
  0x22   : > { %p56_p13 = scmp.eq.s32.totalorder %s1267_s29, 0  ;;  %s1630_s15 = smov (%p43_p11, %s41_s15), 0 }
  0x23   : > { %1617 = sst [smem:[#allocation20_spill]] %s1630_s15  ;;  %p1419_p3 = por %p1354_p2, %p55_p12 }
  0x24   : > { %p1413_p0 = por %p56_p13, %p55_p12  ;;  %s45_s8 = ssub.s32 %s1263_s28, %s1630_s15 }
  0x25   : > { %p963_p5 = scmp.lt.s32.totalorder %s1267_s29, 4  ;;  %p46_p7 = scmp.eq.s32.totalorder %s45_s8, 0 }
  0x26   : > { %s324_s1 = sand.u32 1, %s1255_s26   ;;  %s886_s17 = sshll.u32 %s1263_s28, 6 }
  0x27   : > { %s868_s13 = sshll.u32 %s324_s1, 6  ;;  %s333_s23 = scalar_lea.hbm %s1592_s0, %s886_s17 }
  0x28   : > { %s1428_s14 = scalar_select %p46_p7, %s1255_s26, %s48_s18  }
  0x29   : > { %s328_s30 = scalar_lea.vmem [#allocation3], %s868_s13  ;;  %s334_s10 = sshll.u32 %s333_s23, 4  ;;  %s335_s10 = int_to_ptr.hbm [resolvable:$true] %s334_s10 }
  0x2a   : > { %s336_s2 = sshll.u32 %s328_s30, 4  ;;  %p950_p2 = pnand %p963_p5, %p1413_p0  ;;  %s337_s2 = int_to_ptr.vmem [resolvable:$true] %s336_s2 }
  0x2b   : > { %s325_s3 = scalar_lea.sflag [#allocation4], %s324_s1  ;;  %s1620_s15 = smov 8  }
  0x2c   : > { %s1621_s12 = smov 128   ;;  %348 = sbr.rel (%p1373_p8) target bundleno = 405 (0x195), region = 44 }
  0x2d   : > { %952 = dma.hbm_to_vmem [thread:$0]  (!%p950_p2), %s335_s10, 1024, %s337_s2, %s325_s3, %s1621_s12, %s1621_s12, %s1620_s15  }
  0x2e   : > { %s1442_s18 = sand.u32 (!%p1373_p8), 1, %s1251_s25  }
  0x2f   : > { %s1445_s30 = sshll.u32 (!%p1373_p8), %s1442_s18, 6  ;;  %s351_s23 = scalar_lea.sflag (!%p1373_p8), [#allocation4], %s1442_s18 }
  0x30   : > { %s1449_s22 = scalar_lea.vmem (!%p1373_p8), [#allocation3], %s1445_s30 }
  0x31   : > { %1226 = dma.done.wait (%p1360_p4), %s351_s23, 1024  }
  0x32   : > { %1228 = vsyncadd (%p1360_p4), %s351_s23, 4294966272 }
  0x33   : > { %1230 = dma.done.wait (%p1350_p1), [#allocation7], 4096  }
  0x34   : > { %1232 = vsyncadd (%p1350_p1), [#allocation7], 4294963200 }
  0x35   : > { %1234 = dma.done.wait (%p1350_p1), [#allocation10], 2048  }
  0x36   : > { %1236 = vsyncadd (%p1350_p1), [#allocation10], 4294965248  ;;  %v448_v0 = vld [vmem:[#allocation8 + $0x78] sm:$0xff]  ;;  %v447_v1 = vld [vmem:[#allocation8 + $0x70] sm:$0xff]  ;;  %s1495_s9 = scalar_lea.vmem [#allocation11], %s1445_s30  ;;  %s1507_s16 = scalar_lea.vmem [#allocation12], %s1445_s30 }
  0x37   : > { %449 = vmatpush.msra.mxu0 %v448_v0  ;;  %889 = vmatpush.msra.mxu3 %v448_v0  ;;  %v446_v2 = vld [vmem:[#allocation8 + $0x68] sm:$0xff]  ;;  %v445_v3 = vld [vmem:[#allocation8 + $0x60] sm:$0xff]  ;;  %v444_v4 = vld [vmem:[#allocation8 + $0x58] sm:$0xff]  ;;  %s887_s15 = sshll.u32 %s1259_s27, 6  ;;  %s663_s17 = sshll.u32 %s1495_s9, 4  ;;  %s664_s17 = int_to_ptr.vmem [resolvable:$true] %s663_s17 }
  0x38   : > { %v443_v5 = vld [vmem:[#allocation8 + $0x50] sm:$0xff]  ;;  %v442_v6 = vld [vmem:[#allocation8 + $0x48] sm:$0xff]  ;;  %v441_v7 = vld [vmem:[#allocation8 + $0x40] sm:$0xff]  ;;  %s662_s13 = scalar_lea.hbm %s1598_s6, %s887_s15  ;;  %s645_s21 = scalar_lea.sflag [#allocation5], %s1442_s18 }
  0x39   : > { %450 = vmatpush.msra.mxu0 %v447_v1  ;;  %890 = vmatpush.msra.mxu3 %v447_v1  ;;  %v440_v8 = vld [vmem:[#allocation8 + $0x38] sm:$0xff]  ;;  %v439_v9 = vld [vmem:[#allocation8 + $0x30] sm:$0xff]  ;;  %v438_v10 = vld [vmem:[#allocation8 + $0x28] sm:$0xff]  ;;  %s665_s20 = sshll.u32 %s662_s13, 4  ;;  %s1165_s2 = scalar_lea.hbm %s1598_s6, 256  ;;  %s666_s20 = int_to_ptr.hbm [resolvable:$true] %s665_s20 }
  0x3a   : > { %v437_v11 = vld [vmem:[#allocation8 + $0x20] sm:$0xff]  ;;  %v436_v12 = vld [vmem:[#allocation8 + $0x18] sm:$0xff]  ;;  %v435_v13 = vld [vmem:[#allocation8 + $0x10] sm:$0xff]  ;;  %s1159_s10 = sshra.s32 %s666_s20, 4  ;;  %s1160_s10 = int_to_ptr.hbm [resolvable:$true] %s1159_s10 }
  0x3b   : > { %451 = vmatpush.msra.mxu0 %v446_v2  ;;  %891 = vmatpush.msra.mxu3 %v446_v2  ;;  %v434_v14 = vld [vmem:[#allocation8 + $0x8] sm:$0xff]  ;;  %v433_v15 = vld [vmem:[#allocation8] sm:$0xff]  ;;  %v1472_v18 = vld [vmem:[%s1449_s22 + $0x30] sm:$0xff]  ;;  %s1161_s30 = scalar_lea.hbm %s1160_s10, 64  ;;  %p1166_p9 = scmp.lt.s32.totalorder %s1160_s10, %s1598_s6 }
  0x3c   : > { %v1464_v16 = vld [vmem:[%s1449_s22] sm:$0xff]  ;;  %v1468_v17 = vld [vmem:[%s1449_s22 + $0x8] sm:$0xff]  ;;  %v590_v19 = vld [vmem:[#allocation9 + $0x78] sm:$0xff]  ;;  %p1162_p1 = scmp.ne.s32.totalorder %s1160_s10, %s1161_s30  ;;  %p1167_p10 = scmp.lt.s32.totalorder %s1165_s2, %s1161_s30 }
  0x3d   : > { %452 = vmatpush.msra.mxu0 %v445_v3  ;;  %892 = vmatpush.msra.mxu3 %v445_v3  ;;  %v589_v20 = vld [vmem:[#allocation9 + $0x70] sm:$0xff]  ;;  %v588_v21 = vld [vmem:[#allocation9 + $0x68] sm:$0xff]  ;;  %v513_v22 = vld [vmem:[#allocation6 + $0x78] sm:$0xff] }
  0x3e   : > { %595 = vmatpush.msra.mxu2 %v590_v19  ;;  %v512_v23 = vld [vmem:[#allocation6 + $0x70] sm:$0xff]  ;;  %v587_v24 = vld [vmem:[#allocation9 + $0x60] sm:$0xff]  ;;  %518 = vmatpush.msra.mxu1 %v513_v22  ;;  %v511_v26 = vld [vmem:[#allocation6 + $0x68] sm:$0xff]  ;;  %p1163_p4 = pnand %p1162_p1, %p1419_p3  ;;  %p1168_p11 = por %p1167_p10, %p1166_p9 }
  0x3f   : > { %453 = vmatpush.msra.mxu0 %v444_v4  ;;  %893 = vmatpush.msra.mxu3 %v444_v4  ;;  %v1476_v25 = vld [vmem:[%s1449_s22 + $0x10] sm:$0xff]  ;;  %v1479_v27 = vld [vmem:[%s1449_s22 + $0x38] sm:$0xff]  ;;  %v510_v29 = vld [vmem:[#allocation6 + $0x60] sm:$0xff] }
  0x40   : > { %596 = vmatpush.msra.mxu2 %v589_v20  ;;  %v586_v28 = vld [vmem:[#allocation9 + $0x58] sm:$0xff]  ;;  %519 = vmatpush.msra.mxu1 %v512_v23  ;;  %v585_v30 = vld [vmem:[#allocation9 + $0x50] sm:$0xff]  ;;  %v584_v32 = vld [vmem:[#allocation9 + $0x48] sm:$0xff]  ;;  %p1164_p8 = pneg %p1163_p4 }
  0x41   : > { %454 = vmatpush.msra.mxu0 %v443_v5  ;;  %894 = vmatpush.msra.mxu3 %v443_v5  ;;  %v509_v31 = vld [vmem:[#allocation6 + $0x58] sm:$0xff]  ;;  %v508_v33 = vld [vmem:[#allocation6 + $0x50] sm:$0xff]  ;;  %v583_v34 = vld [vmem:[#allocation9 + $0x40] sm:$0xff] }
  0x42   : > { %597 = vmatpush.msra.mxu2 %v588_v21  ;;  %520 = vmatpush.msra.mxu1 %v511_v26  ;;  %v424_v35 = vld [vmem:[%s1449_s22 + $0x18] sm:$0xff]  ;;  %v507_v36 = vld [vmem:[#allocation6 + $0x48] sm:$0xff]  ;;  %v506_v38 = vld [vmem:[#allocation6 + $0x40] sm:$0xff]  ;;  %p1169_p12 = pnand %p1168_p11, %p1164_p8 }
  0x43   : > { %455 = vmatpush.msra.mxu0 %v442_v6  ;;  %895 = vmatpush.msra.mxu3 %v442_v6  ;;  %v582_v37 = vld [vmem:[#allocation9 + $0x38] sm:$0xff]  ;;  %v581_v39 = vld [vmem:[#allocation9 + $0x30] sm:$0xff]  ;;  %v580_v40 = vld [vmem:[#allocation9 + $0x28] sm:$0xff] }
  0x44   : > { %598 = vmatpush.msra.mxu2 %v587_v24  ;;  %521 = vmatpush.msra.mxu1 %v510_v29  ;;  %v579_v41 = vld [vmem:[#allocation9 + $0x20] sm:$0xff]  ;;  %v578_v43 = vld [vmem:[#allocation9 + $0x18] sm:$0xff]  ;;  %v577_v44 = vld [vmem:[#allocation9 + $0x10] sm:$0xff] }
  0x45   : > { %456 = vmatpush.msra.mxu0 %v441_v7  ;;  %896 = vmatpush.msra.mxu3 %v441_v7  ;;  %v425_v42 = vld [vmem:[%s1449_s22 + $0x20] sm:$0xff]  ;;  %v576_v45 = vld [vmem:[#allocation9 + $0x8] sm:$0xff]  ;;  %v505_v47 = vld [vmem:[#allocation6 + $0x38] sm:$0xff] }
  0x46   : > { %599 = vmatpush.msra.mxu2 %v586_v28  ;;  %522 = vmatpush.msra.mxu1 %v509_v31  ;;  %v426_v46 = vld [vmem:[%s1449_s22 + $0x28] sm:$0xff]  ;;  %v575_v48 = vld [vmem:[#allocation9] sm:$0xff]  ;;  %v504_v49 = vld [vmem:[#allocation6 + $0x30] sm:$0xff] }
  0x47   : > { %457 = vmatpush.msra.mxu0 %v440_v8  ;;  %897 = vmatpush.msra.mxu3 %v440_v8  ;;  %v503_v50 = vld [vmem:[#allocation6 + $0x28] sm:$0xff]  ;;  %v502_v51 = vld [vmem:[#allocation6 + $0x20] sm:$0xff]  ;;  %v501_v52 = vld [vmem:[#allocation6 + $0x18] sm:$0xff] }
  0x48   : > { %600 = vmatpush.msra.mxu2 %v585_v30  ;;  %523 = vmatpush.msra.mxu1 %v508_v33  ;;  %v500_v53 = vld [vmem:[#allocation6 + $0x10] sm:$0xff]  ;;  %v499_v54 = vld [vmem:[#allocation6 + $0x8] sm:$0xff]  ;;  %v498_v55 = vld [vmem:[#allocation6] sm:$0xff] }
  0x49   : > { %458 = vmatpush.msra.mxu0 %v439_v9  ;;  %898 = vmatpush.msra.mxu3 %v439_v9  ;;  %v1024_v0 = vld [vmem:[%s1596_s4] ss:$0 sm:$0xff] }
  0x4a   : > { %601 = vmatpush.msra.mxu2 %v584_v32  ;;  %524 = vmatpush.msra.mxu1 %v507_v36  ;;  %v1503_v7 = vld [vmem:[%s1597_s5] ss:$0 sm:$0xff] }
  0x4b   : > { %459 = vmatpush.msra.mxu0 %v438_v10  ;;  %899 = vmatpush.msra.mxu3 %v438_v10 }
  0x4c   : > { %602 = vmatpush.msra.mxu2 %v583_v34  ;;  %525 = vmatpush.msra.mxu1 %v506_v38 }
  0x4d   : > { %460 = vmatpush.msra.mxu0 %v437_v11  ;;  %900 = vmatpush.msra.mxu3 %v437_v11 }
  0x4e   : > { %603 = vmatpush.msra.mxu2 %v582_v37  ;;  %526 = vmatpush.msra.mxu1 %v505_v47 }
  0x4f   : > { %461 = vmatpush.msra.mxu0 %v436_v12  ;;  %901 = vmatpush.msra.mxu3 %v436_v12 }
  0x50   : > { %604 = vmatpush.msra.mxu2 %v581_v39  ;;  %527 = vmatpush.msra.mxu1 %v504_v49 }
  0x51   : > { %462 = vmatpush.msra.mxu0 %v435_v13  ;;  %902 = vmatpush.msra.mxu3 %v435_v13 }
  0x52   : > { %605 = vmatpush.msra.mxu2 %v580_v40  ;;  %528 = vmatpush.msra.mxu1 %v503_v50 }
  0x53   : > { %463 = vmatpush.msra.mxu0 %v434_v14  ;;  %903 = vmatpush.msra.mxu3 %v434_v14 }
  0x54   : > { %606 = vmatpush.msra.mxu2 %v579_v41  ;;  %529 = vmatpush.msra.mxu1 %v502_v51 }
  0x55   : > { %464 = vmatpush.msra.mxu0 %v433_v15  ;;  %904 = vmatpush.msra.mxu3 %v433_v15 }
  0x56   : > { %465 = vmatmul.f32.vlgmr.msra.gmra.mxu0 %v1464_v16  ;;  %483 = vmatmul.f32.vlgmr.msra.gmra.mxu3 %v1472_v18 }
  0x57   : > { %905 = vmatpush.msrb.mxu3 %v513_v22  ;;  %607 = vmatpush.msra.mxu2 %v578_v43 }
  0x58   : > { %530 = vmatpush.msra.mxu1 %v501_v52 }
  0x59   : > { %906 = vmatpush.msrb.mxu3 %v512_v23  ;;  %608 = vmatpush.msra.mxu2 %v577_v44 }
  0x5a   : > { %531 = vmatpush.msra.mxu1 %v500_v53 }
  0x5b   : > { %907 = vmatpush.msrb.mxu3 %v511_v26  ;;  %609 = vmatpush.msra.mxu2 %v576_v45 }
  0x5c   : > { %532 = vmatpush.msra.mxu1 %v499_v54 }
  0x5d   : > { %908 = vmatpush.msrb.mxu3 %v510_v29  ;;  %610 = vmatpush.msra.mxu2 %v575_v48 }
  0x5e   : > { %468 = vmatmul.f32.gmra.mxu0 %v1468_v17  ;;  %486 = vmatmul.f32.gmra.mxu3 %v1479_v27 }
  0x5f   : > { %909 = vmatpush.msrb.mxu3 %v509_v31  ;;  %533 = vmatpush.msra.mxu1 %v498_v55 }
  0x60   : > { %534 = vmatmul.f32.vlgmr.msra.gmra.mxu1 %v1464_v16 }
  0x61   : > { %910 = vmatpush.msrb.mxu3 %v508_v33 }
  0x63   : > { %911 = vmatpush.msrb.mxu3 %v507_v36 }
  0x65   : > { %912 = vmatpush.msrb.mxu3 %v506_v38 }
  0x66   : > { %471 = vmatmul.f32.gmra.mxu0 %v1476_v25 }
  0x67   : > { %913 = vmatpush.msrb.mxu3 %v505_v47 }
  0x68   : > { %537 = vmatmul.f32.gmra.mxu1 %v1468_v17 }
  0x69   : > { %914 = vmatpush.msrb.mxu3 %v504_v49 }
  0x6b   : > { %915 = vmatpush.msrb.mxu3 %v503_v50 }
  0x6d   : > { %916 = vmatpush.msrb.mxu3 %v502_v51 }
  0x6e   : > { %474 = vmatmul.f32.gmra.mxu0 %v424_v35 }
  0x6f   : > { %917 = vmatpush.msrb.mxu3 %v501_v52 }
  0x70   : > { %540 = vmatmul.f32.gmra.mxu1 %v1476_v25 }
  0x71   : > { %918 = vmatpush.msrb.mxu3 %v500_v53 }
  0x73   : > { %919 = vmatpush.msrb.mxu3 %v499_v54 }
  0x75   : > { %920 = vmatpush.msrb.mxu3 %v498_v55 }
  0x76   : > { %477 = vmatmul.f32.gmra.mxu0 %v425_v42  ;;  %555 = vmatmul.f32.vlgmr.msrb.gmra.mxu3 %v1479_v27 }
  0x78   : > { %543 = vmatmul.f32.gmra.mxu1 %v424_v35 }
  0x7e   : > { %480 = vmatmul.f32.gmra.mxu0 %v426_v46 }
  0x80   : > { %546 = vmatmul.f32.gmra.mxu1 %v425_v42 }
  0x88   : > { %549 = vmatmul.f32.gmra.mxu1 %v426_v46 }
  0x90   : > { %552 = vmatmul.f32.gmra.mxu1 %v1472_v18 }
  0xd3   : > { %v466_v56 = vpop.f32.mrf.mxu0 }
  0xd4   : > { %611 = vmatmul.f32.vlgmr.msra.gmra.mxu2 %v466_v56 }
  0xd9   : > { %v484_v62 = vpop.f32.mrf.mxu3 }
  0xdb   : > { %v469_v57 = vpop.f32.mrf.mxu0 }
  0xdc   : > { %614 = vmatmul.f32.gmra.mxu2 %v469_v57 }
  0xdd   : > { %v535_v1 = vpop.f32.mrf.mxu1 }
  0xde   : > { %v536_v2 = vadd.f32 %v1024_v0, %v535_v1 }
  0xe0   : > { %559 = vst [vmem:[%s1495_s9] sm:$0xff] %v536_v2 }
  0xe1   : > { %v487_v63 = vpop.f32.mrf.mxu3 }
  0xe3   : > { %v472_v58 = vpop.f32.mrf.mxu0 }
  0xe4   : > { %617 = vmatmul.f32.gmra.mxu2 %v472_v58 }
  0xe5   : > { %v538_v3 = vpop.f32.mrf.mxu1 }
  0xe6   : > { %v539_v4 = vadd.f32 %v1024_v0, %v538_v3 }
  0xe8   : > { %560 = vst [vmem:[%s1495_s9 + $0x8] sm:$0xff] %v539_v4 }
  0xeb   : > { %v475_v59 = vpop.f32.mrf.mxu0 }
  0xec   : > { %620 = vmatmul.f32.gmra.mxu2 %v475_v59 }
  0xed   : > { %v541_v5 = vpop.f32.mrf.mxu1 }
  0xee   : > { %v542_v6 = vadd.f32 %v1024_v0, %v541_v5 }
  0xf0   : > { %561 = vst [vmem:[%s1495_s9 + $0x10] sm:$0xff] %v542_v6 }
  0xf3   : > { %v478_v60 = vpop.f32.mrf.mxu0 }
  0xf4   : > { %623 = vmatmul.f32.gmra.mxu2 %v478_v60 }
  0xf5   : > { %v544_v9 = vpop.f32.mrf.mxu1 }
  0xf6   : > { %v545_v11 = vadd.f32 %v1024_v0, %v544_v9 }
  0xf8   : > { %562 = vst [vmem:[%s1495_s9 + $0x18] sm:$0xff] %v545_v11 }
  0xf9   : > { %v556_v20 = vpop.f32.mrf.mxu3 }
  0xfa   : > { %v557_v21 = vadd.f32 %v1024_v0, %v556_v20 }
  0xfb   : > { %v481_v61 = vpop.f32.mrf.mxu0 }
  0xfc   : > { %626 = vmatmul.f32.gmra.mxu2 %v481_v61  ;;  %566 = vst [vmem:[%s1495_s9 + $0x38] sm:$0xff] %v557_v21 }
  0xfd   : > { %v547_v13 = vpop.f32.mrf.mxu1 }
  0xfe   : > { %v548_v15 = vadd.f32 %v1024_v0, %v547_v13 }
 0x100   : > { %563 = vst [vmem:[%s1495_s9 + $0x20] sm:$0xff] %v548_v15 }
 0x104   : > { %629 = vmatmul.f32.gmra.mxu2 %v484_v62 }
 0x105   : > { %v550_v17 = vpop.f32.mrf.mxu1 }
 0x106   : > { %v551_v19 = vadd.f32 %v1024_v0, %v550_v17 }
 0x108   : > { %564 = vst [vmem:[%s1495_s9 + $0x28] sm:$0xff] %v551_v19 }
 0x10c   : > { %632 = vmatmul.f32.gmra.mxu2 %v487_v63 }
 0x10d   : > { %v553_v23 = vpop.f32.mrf.mxu1 }
 0x10e   : > { %v554_v25 = vadd.f32 %v1024_v0, %v553_v23 }
 0x110   : > { %565 = vst [vmem:[%s1495_s9 + $0x30] sm:$0xff] %v554_v25 }
 0x157   : > { %v612_v8 = vpop.f32.mrf.mxu2 }
 0x158   : > { %v613_v10 = vadd.f32 %v1503_v7, %v612_v8 }
 0x15a   : > { %636 = vst [vmem:[%s1507_s16] sm:$0xff] %v613_v10 }
 0x15f   : > { %v615_v12 = vpop.f32.mrf.mxu2 }
 0x160   : > { %v616_v14 = vadd.f32 %v1503_v7, %v615_v12 }
 0x162   : > { %637 = vst [vmem:[%s1507_s16 + $0x8] sm:$0xff] %v616_v14 }
 0x167   : > { %v618_v16 = vpop.f32.mrf.mxu2 }
 0x168   : > { %v619_v18 = vadd.f32 %v1503_v7, %v618_v16 }
 0x16a   : > { %638 = vst [vmem:[%s1507_s16 + $0x10] sm:$0xff] %v619_v18 }
 0x16f   : > { %v621_v22 = vpop.f32.mrf.mxu2 }
 0x170   : > { %v622_v24 = vadd.f32 %v1503_v7, %v621_v22 }
 0x172   : > { %639 = vst [vmem:[%s1507_s16 + $0x18] sm:$0xff] %v622_v24 }
 0x173   : > { %1172 = shalt.err (!%p1169_p12)
}
 0x174   : > { %s1274_s9 = smov 128   ;;  %s1275_s12 = smov 8  }
 0x175   : > { %935 = dma.vmem_to_hbm [thread:$0]  (%p1419_p3), %s664_s17, 1024, %s666_s20, %s645_s21, %s1274_s9, %s1274_s9, %s1275_s12  }
 0x176   : > { %s680_s13 = scalar_lea.hbm %s1599_s7, %s887_s15  ;;  %s681_s17 = sshll.u32 %s1507_s16, 4  ;;  %s682_s17 = int_to_ptr.vmem [resolvable:$true] %s681_s17 }
 0x177   : > { %v624_v26 = vpop.f32.mrf.mxu2  ;;  %s683_s20 = sshll.u32 %s680_s13, 4  ;;  %s650_s21 = scalar_lea.sflag [#allocation13], %s1442_s18  ;;  %s684_s20 = int_to_ptr.hbm [resolvable:$true] %s683_s20 }
 0x178   : > { %v625_v27 = vadd.f32 %v1503_v7, %v624_v26  ;;  %s1187_s10 = sshra.s32 %s684_s20, 4  ;;  %s1193_s15 = scalar_lea.hbm %s1599_s7, 256  ;;  %s1188_s10 = int_to_ptr.hbm [resolvable:$true] %s1187_s10 }
 0x179   : > { %s1189_s30 = scalar_lea.hbm %s1188_s10, 64  ;;  %p1194_p7 = scmp.lt.s32.totalorder %s1188_s10, %s1599_s7 }
 0x17a   : > { %640 = vst [vmem:[%s1507_s16 + $0x20] sm:$0xff] %v625_v27  ;;  %p1190_p13 = scmp.ne.s32.totalorder %s1188_s10, %s1189_s30  ;;  %p1195_p2 = scmp.lt.s32.totalorder %s1193_s15, %s1189_s30 }
 0x17c   : > { %p1191_p0 = pnand %p1190_p13, %p1419_p3  ;;  %p1196_p1 = por %p1195_p2, %p1194_p7 }
 0x17e   : > { %p1192_p5 = pneg %p1191_p0 }
 0x17f   : > { %v627_v28 = vpop.f32.mrf.mxu2 }
 0x180   : > { %v628_v29 = vadd.f32 %v1503_v7, %v627_v28  ;;  %p1197_p4 = pnand %p1196_p1, %p1192_p5 }
 0x182   : > { %641 = vst [vmem:[%s1507_s16 + $0x28] sm:$0xff] %v628_v29 }
 0x187   : > { %v630_v30 = vpop.f32.mrf.mxu2 }
 0x188   : > { %v631_v31 = vadd.f32 %v1503_v7, %v630_v30 }
 0x18a   : > { %642 = vst [vmem:[%s1507_s16 + $0x30] sm:$0xff] %v631_v31 }
 0x18f   : > { %v633_v32 = vpop.f32.mrf.mxu2 }
 0x190   : > { %v634_v33 = vadd.f32 %v1503_v7, %v633_v32 }
 0x192   : > { %643 = vst [vmem:[%s1507_s16 + $0x38] sm:$0xff] %v634_v33 }
 0x193   : > { %1200 = shalt.err (!%p1197_p4)
}
 0x194   : > { %936 = dma.vmem_to_hbm [thread:$0]  (%p1419_p3), %s682_s17, 1024, %s684_s20, %s650_s21, %s1274_s9, %s1274_s9, %s1275_s12  }
 0x195 PF: > { %p967_p8 = scmp.ge.s32.totalorder %s1267_s29, 2  ;;  %s698_s16 = sand.u32 1, %s1247_s24  }
 0x196   : > { %s699_s3 = scalar_lea.sflag [#allocation5], %s698_s16 }
 0x197   : > { %p954_p9 = pnand %p967_p8, %p1365_p6 }
 0x199   : > { %p955_p10 = pneg %p954_p9 }
 0x19b   : > { %1238 = dma.done.wait (%p955_p10), %s699_s3, 1024  }
 0x19c   : > { %1240 = vsyncadd (%p955_p10), %s699_s3, 4294966272  ;;  %s709_s11 = scalar_lea.sflag [#allocation13], %s698_s16 }
 0x19d   : > { %1242 = dma.done.wait (%p955_p10), %s709_s11, 1024  }
 0x19e   : > { %1244 = vsyncadd (%p955_p10), %s709_s11, 4294966272  ;;  %s29_s29 = sadd.s32 1, %s1267_s29   ;;  %s1623_s19 = sld [smem:[#allocation20_spill]] }
 0x19f   : > { %p26_p11 = scmp.ge.s32.totalorder %s29_s29, 6   ;;  %s1624_s24 = smov %s1251_s25 }
 0x1a0   : > { %s1625_s25 = smov %s1255_s26  ;;  %s1626_s26 = smov %s1428_s14 }
 0x1a1   : > { %s1627_s27 = smov %s1263_s28  ;;  %28 = sbr.rel (!%p26_p11) target bundleno = 14 (0xe), region = 130 }
 0x1a4   : > { %s1628_s28 = smov %s1623_s19 }
 0x1a6   :  { %715 = vsyncpa [#allocation4], 1 }
 0x1a7   :  { %717 = vsyncpa [#allocation4 + $0x1], 1 }
 0x1a8   :  { %718 = vsyncpa [#allocation7], 1 }
 0x1a9   :  { %719 = vsyncpa [#allocation10], 1 }
 0x1aa   :  { %720 = vsyncpa [#allocation5], 1 }
 0x1ab   :  { %722 = vsyncpa [#allocation5 + $0x1], 1 }
 0x1ac   :  { %723 = vsyncpa [#allocation13], 1 }
 0x1ad   :  { %725 = vsyncpa [#allocation13 + $0x1], 1 }

</bundles_post_ra>
